<compile_context>
chip_gen: v6e
topology: v6e:2x2x1
jax: 0.10.0
libtpu: 0.0.40
codegen_flags: <defaults>
</compile_context>

<pallas_src>
import jax
import jax.numpy as jnp
import numpy as np
from jax.experimental import pallas as pl
from jax.experimental.pallas import tpu as pltpu


def psa_kernel(x_ref,
               wv_ref, bv_ref,      # ch_wv : (C2, C), (C2, 1)
               wq_ref, bq_ref,      # ch_wq : (1,  C), (1,  1)
               wz_ref, bz_ref,      # ch_wz : (C,  C2), (C, 1)
               wsv_ref, bsv_ref,    # sp_wv : (C2, C), (C2, 1)
               wsq_ref, bsq_ref,    # sp_wq : (C2, C), (C2, 1)
               o_ref):
    # All elementwise / accumulation math in f32 (safe for bf16 transport and
    # required on v5e, which has no bf16 VPU/EUP).
    x = x_ref[0].astype(jnp.float32)                                    # (C, HW)
    hw = x.shape[1]
    inv_hw = jnp.float32(1.0 / hw)                                      # compile-time constant

    # ---------------- channel-only self-attention branch ----------------
    # channel_wq logits: (1,C)@(C,HW) -> (1,HW) — lane-dense MXU pass, no
    # degenerate 1-column matmul.
    cwq = jnp.dot(wq_ref[...].astype(jnp.float32), x,
                  preferred_element_type=jnp.float32) + bq_ref[...].astype(jnp.float32)
    # softmax over the spatial (HW) axis; divide -> EUP approx reciprocal.
    m = jnp.max(cwq, axis=1, keepdims=True)
    e = jnp.exp(cwq - m)
    alpha = e * pl.reciprocal(jnp.sum(e, axis=1, keepdims=True), approx=True)   # (1, HW)

    # Independent of the alpha chain: spatial mean of x (used by the spatial
    # branch via linearity of the mean) — XLU reduce overlaps VPU/EUP work.
    x_mean = jnp.sum(x, axis=1, keepdims=True) * inv_hw                 # (C, 1)

    # channel_wz = Wv @ (x @ alpha^T) + bv   (since sum(alpha) == 1)
    x_red = jnp.sum(x * alpha, axis=1, keepdims=True)                   # (C, 1)
    ch_wz = jnp.dot(wv_ref[...].astype(jnp.float32), x_red,
                    preferred_element_type=jnp.float32) + bv_ref[...].astype(jnp.float32)  # (C2, 1)
    ch_logit = jnp.dot(wz_ref[...].astype(jnp.float32), ch_wz,
                       preferred_element_type=jnp.float32) + bz_ref[...].astype(jnp.float32)  # (C, 1)
    ch_weight = jax.nn.sigmoid(ch_logit)                                # (C, 1)
    channel_out = ch_weight * x                                         # (C, HW)

    # ---------------- spatial-only self-attention branch ----------------
    # agp(sp_wq(channel_out)) = Wsq @ (ch_weight * mean(x)) + bsq  (mean is linear)
    co_mean = ch_weight * x_mean                                        # (C, 1)
    q = jnp.dot(wsq_ref[...].astype(jnp.float32), co_mean,
                preferred_element_type=jnp.float32) + bsq_ref[...].astype(jnp.float32)      # (C2, 1)
    qm = jnp.max(q, axis=0, keepdims=True)
    qe = jnp.exp(q - qm)
    q_soft = qe * pl.reciprocal(jnp.sum(qe, axis=0, keepdims=True), approx=True)            # (C2, 1)

    # spatial_wz = q_soft^T @ (Wsv @ co + bsv) = (q_soft^T Wsv) @ co + q_soft^T bsv
    v_eff = jnp.sum(wsv_ref[...].astype(jnp.float32) * q_soft, axis=0, keepdims=True)       # (1, C)
    b_eff = jnp.sum(bsv_ref[...].astype(jnp.float32) * q_soft, axis=0, keepdims=True)       # (1, 1)
    sp_logit = jnp.dot(v_eff, channel_out,
                       preferred_element_type=jnp.float32) + b_eff      # (1, HW)
    sp_weight = jax.nn.sigmoid(sp_logit)                                # (1, HW)

    # Lane-dense store: last dim HW = 256 (2 x 128 lanes) -> unmasked vst.
    o_ref[0] = (sp_weight * channel_out).astype(o_ref.dtype)


def sequential_polarized_self_attention(x_nchw, params, *, transport_dtype=None):
    """params = (w_ch_wv (C2,C), b_ch_wv (C2,1), w_ch_wq (1,C), b_ch_wq (1,1),
                 w_ch_wz (C,C2), b_ch_wz (C,1),  w_sp_wv (C2,C), b_sp_wv (C2,1),
                 w_sp_wq (C2,C), b_sp_wq (C2,1))   — PyTorch (Cout, Cin) orientation.

    `transport_dtype=jnp.bfloat16` halves HBM traffic on v6e/v7x (math stays f32
    inside the kernel); leave None (f32) on v5e or when bit-tight accuracy is needed.
    """
    b, c, h, w = x_nchw.shape
    hw = h * w
    c2 = c // 2

    # (B,C,H,W) -> (B,C,HW) is a free, contiguous reshape — no transpose, no
    # extra HBM round trip.
    x_bchw = x_nchw.reshape(b, c, hw)
    if transport_dtype is not None:
        x_bchw = x_bchw.astype(transport_dtype)
        params = tuple(p.astype(transport_dtype) for p in params)

    def full(shape):
        n = len(shape)
        return pl.BlockSpec(shape, lambda *i, _n=n: (0,) * _n)

    grid_spec = pltpu.PrefetchScalarGridSpec(
        num_scalar_prefetch=0,
        # One image per grid step: on v7x both TensorCores get a step
        # ("parallel"); on single-TC v5e/v6e it is a serial loop over
        # full-image blocks, so the ~0.35us per-step cost is negligible.
        grid=(b,),
        in_specs=[pl.BlockSpec((1, c, hw), lambda i: (i, 0, 0)),
                  full((c2, c)), full((c2, 1)),    # ch_wv
                  full((1, c)),  full((1, 1)),     # ch_wq
                  full((c, c2)), full((c, 1)),     # ch_wz
                  full((c2, c)), full((c2, 1)),    # sp_wv
                  full((c2, c)), full((c2, 1))],   # sp_wq
        out_specs=pl.BlockSpec((1, c, hw), lambda i: (i, 0, 0)),
    )

    # VMEM sizing: in/out image tiles are double-buffered in the transport
    # dtype, plus an f32 working set (x, channel_out, partials) inside the
    # body.  Only raise the scoped VMEM limit when the default 32 MiB would be
    # exceeded (e.g. C=512, HW~4096); stay under v7x's 64 MiB physical VMEM.
    itemsize = jnp.dtype(x_bchw.dtype).itemsize
    vmem_needed = 4 * c * hw * itemsize + 3 * c * hw * 4 + (2 << 20)
    compiler_kwargs = dict(dimension_semantics=("parallel",))
    if vmem_needed > (32 << 20):
        compiler_kwargs["vmem_limit_bytes"] = int(min(vmem_needed, 60 << 20))

    out = pl.pallas_call(
        psa_kernel,
        out_shape=jax.ShapeDtypeStruct((b, c, hw), x_nchw.dtype),
        grid_spec=grid_spec,
        compiler_params=pltpu.CompilerParams(**compiler_kwargs),
    )(x_bchw, *params)

    return out.reshape(b, c, h, w)


def reference(x, wv, bv, wq, bq, wz, bz, wsv, bsv, wsq, bsq):
    """Pure-JAX replica of the PyTorch forward (NCHW); weights in (Cout, Cin)."""
    b, c, h, w = x.shape
    c2 = c // 2

    def conv1x1(inp, W, bias):
        return jnp.einsum('bihw,oi->bohw', inp, W) + bias.reshape(1, -1, 1, 1)

    channel_wv = conv1x1(x, wv, bv).reshape(b, c2, -1)
    channel_wq = conv1x1(x, wq, bq).reshape(b, -1, 1)
    channel_wq = jax.nn.softmax(channel_wq, axis=1)
    channel_wz = jnp.matmul(channel_wv, channel_wq)[..., None]            # (b, c2, 1, 1)
    channel_weight = jax.nn.sigmoid(conv1x1(channel_wz, wz, bz)).reshape(b, c, 1, 1)
    channel_out = channel_weight * x
    spatial_wv = conv1x1(channel_out, wsv, bsv).reshape(b, c2, -1)
    spatial_wq = conv1x1(channel_out, wsq, bsq).mean(axis=(2, 3)).reshape(b, 1, c2)
    spatial_wq = jax.nn.softmax(spatial_wq, axis=-1)
    spatial_wz = jnp.matmul(spatial_wq, spatial_wv)
    spatial_weight = jax.nn.sigmoid(spatial_wz.reshape(b, 1, h, w))
    return spatial_weight * channel_out


if __name__ == "__main__":
    B, C, H, W = 2, 64, 16, 16
    C2 = C // 2

    key = jax.random.PRNGKey(0)
    keys = jax.random.split(key, 11)
    x = jax.random.normal(keys[0], (B, C, H, W), dtype=jnp.float32)

    # Deterministic synthetic parameters, PyTorch (Cout, Cin) orientation.
    scale = 0.1
    w_ch_wv = scale * jax.random.normal(keys[1], (C2, C), dtype=jnp.float32)
    b_ch_wv = scale * jax.random.normal(keys[2], (C2, 1), dtype=jnp.float32)
    w_ch_wq = scale * jax.random.normal(keys[3], (1, C), dtype=jnp.float32)
    b_ch_wq = scale * jax.random.normal(keys[4], (1, 1), dtype=jnp.float32)
    w_ch_wz = scale * jax.random.normal(keys[5], (C, C2), dtype=jnp.float32)
    b_ch_wz = scale * jax.random.normal(keys[6], (C, 1), dtype=jnp.float32)
    w_sp_wv = scale * jax.random.normal(keys[7], (C2, C), dtype=jnp.float32)
    b_sp_wv = scale * jax.random.normal(keys[8], (C2, 1), dtype=jnp.float32)
    w_sp_wq = scale * jax.random.normal(keys[9], (C2, C), dtype=jnp.float32)
    b_sp_wq = scale * jax.random.normal(keys[10], (C2, 1), dtype=jnp.float32)

    params = (w_ch_wv, b_ch_wv, w_ch_wq, b_ch_wq, w_ch_wz, b_ch_wz,
              w_sp_wv, b_sp_wv, w_sp_wq, b_sp_wq)

    out = sequential_polarized_self_attention(x, params)
    out = jax.block_until_ready(out)

    ref = reference(x, w_ch_wv, b_ch_wv[:, 0], w_ch_wq, b_ch_wq[:, 0],
                    w_ch_wz, b_ch_wz[:, 0], w_sp_wv, b_sp_wv[:, 0],
                    w_sp_wq, b_sp_wq[:, 0])
    ref = jax.block_until_ready(ref)

    # Tolerance covers f32 reassociation of the algebraically-folded branches
    # plus the EUP approximate reciprocal used in the two softmax denominators.
    np.testing.assert_allclose(np.asarray(out), np.asarray(ref),
                               rtol=5e-4, atol=5e-5)
    print("KERNEL_OK")
</pallas_src>

<mosaic_0001>
module attributes {stable_mosaic.version = 11 : i64} {
  func.func @psa_kernel(%arg0: i32, %arg1: memref<1x64x256xf32, #tpu.memory_space<vmem>>, %arg2: memref<32x64xf32, #tpu.memory_space<vmem>>, %arg3: memref<32x1xf32, #tpu.memory_space<vmem>>, %arg4: memref<1x64xf32, #tpu.memory_space<vmem>>, %arg5: memref<1x1xf32, #tpu.memory_space<vmem>>, %arg6: memref<64x32xf32, #tpu.memory_space<vmem>>, %arg7: memref<64x1xf32, #tpu.memory_space<vmem>>, %arg8: memref<32x64xf32, #tpu.memory_space<vmem>>, %arg9: memref<32x1xf32, #tpu.memory_space<vmem>>, %arg10: memref<32x64xf32, #tpu.memory_space<vmem>>, %arg11: memref<32x1xf32, #tpu.memory_space<vmem>>, %arg12: memref<1x64x256xf32, #tpu.memory_space<vmem>>) attributes {dimension_semantics = [#tpu.dimension_semantics<parallel>], iteration_bounds = array<i64: 2>, scalar_prefetch = 0 : i64, scratch_operands = 0 : i64, tpu.core_type = #tpu.core_type<tc>, window_params = [{transform_indices = @transform_0, window_bounds = array<i64: 1, 64, 256>}, {pipeline_mode = #tpu.pipeline_mode<synchronous>, transform_indices = @transform_1, window_bounds = array<i64: 32, 64>}, {pipeline_mode = #tpu.pipeline_mode<synchronous>, transform_indices = @transform_2, window_bounds = array<i64: 32, 1>}, {pipeline_mode = #tpu.pipeline_mode<synchronous>, transform_indices = @transform_3, window_bounds = array<i64: 1, 64>}, {pipeline_mode = #tpu.pipeline_mode<synchronous>, transform_indices = @transform_4, window_bounds = array<i64: 1, 1>}, {pipeline_mode = #tpu.pipeline_mode<synchronous>, transform_indices = @transform_5, window_bounds = array<i64: 64, 32>}, {pipeline_mode = #tpu.pipeline_mode<synchronous>, transform_indices = @transform_6, window_bounds = array<i64: 64, 1>}, {pipeline_mode = #tpu.pipeline_mode<synchronous>, transform_indices = @transform_7, window_bounds = array<i64: 32, 64>}, {pipeline_mode = #tpu.pipeline_mode<synchronous>, transform_indices = @transform_8, window_bounds = array<i64: 32, 1>}, {pipeline_mode = #tpu.pipeline_mode<synchronous>, transform_indices = @transform_9, window_bounds = array<i64: 32, 64>}, {pipeline_mode = #tpu.pipeline_mode<synchronous>, transform_indices = @transform_10, window_bounds = array<i64: 32, 1>}, {transform_indices = @transform_11, window_bounds = array<i64: 1, 64, 256>}]} {
    %c0 = arith.constant 0 : index
    %c0_0 = arith.constant 0 : index
    %c0_1 = arith.constant 0 : index
    %0 = vector.load %arg1[%c0, %c0_0, %c0_1] : memref<1x64x256xf32, #tpu.memory_space<vmem>>, vector<1x64x256xf32>
    %1 = vector.shape_cast %0 : vector<1x64x256xf32> to vector<64x256xf32>
    %c0_2 = arith.constant 0 : index
    %c0_3 = arith.constant 0 : index
    %2 = vector.load %arg4[%c0_2, %c0_3] : memref<1x64xf32, #tpu.memory_space<vmem>>, vector<1x64xf32>
    %cst = arith.constant dense<0.000000e+00> : vector<1x256xf32>
    %3 = tpu.matmul %2, %1, %cst {dimension_numbers = #tpu.dot_dimension_numbers<[1], [0], [0], [1], [0, 0, 1, 1], [], []>} : vector<1x64xf32>, vector<64x256xf32>, vector<1x256xf32> -> vector<1x256xf32>
    %c0_4 = arith.constant 0 : index
    %c0_5 = arith.constant 0 : index
    %4 = vector.load %arg5[%c0_4, %c0_5] : memref<1x1xf32, #tpu.memory_space<vmem>>, vector<1x1xf32>
    %5 = vector.broadcast %4 : vector<1x1xf32> to vector<1x256xf32>
    %6 = arith.addf %3, %5 : vector<1x256xf32>
    %cst_6 = arith.constant dense<0xFF800000> : vector<1xf32>
    %7 = vector.multi_reduction <maximumf>, %6, %cst_6 [1] : vector<1x256xf32> to vector<1xf32>
    %8 = vector.shape_cast %7 : vector<1xf32> to vector<1x1xf32>
    %9 = vector.broadcast %8 : vector<1x1xf32> to vector<1x256xf32>
    %10 = arith.subf %6, %9 : vector<1x256xf32>
    %11 = math.exp %10 : vector<1x256xf32>
    %cst_7 = arith.constant dense<0.000000e+00> : vector<1xf32>
    %12 = vector.multi_reduction <add>, %11, %cst_7 [1] : vector<1x256xf32> to vector<1xf32>
    %13 = vector.shape_cast %12 : vector<1xf32> to vector<1x1xf32>
    %14 = tpu.reciprocal %13 {approx = true} : vector<1x1xf32> -> vector<1x1xf32>
    %15 = vector.broadcast %14 : vector<1x1xf32> to vector<1x256xf32>
    %16 = arith.mulf %11, %15 : vector<1x256xf32>
    %cst_8 = arith.constant dense<0.000000e+00> : vector<64xf32>
    %17 = vector.multi_reduction <add>, %1, %cst_8 [1] : vector<64x256xf32> to vector<64xf32>
    %18 = vector.shape_cast %17 : vector<64xf32> to vector<64x1xf32>
    %cst_9 = arith.constant 3.906250e-03 : f32
    %19 = vector.broadcast %cst_9 : f32 to vector<64x1xf32>
    %20 = arith.mulf %18, %19 : vector<64x1xf32>
    %21 = vector.broadcast %16 : vector<1x256xf32> to vector<64x256xf32>
    %22 = arith.mulf %1, %21 : vector<64x256xf32>
    %cst_10 = arith.constant dense<0.000000e+00> : vector<64xf32>
    %23 = vector.multi_reduction <add>, %22, %cst_10 [1] : vector<64x256xf32> to vector<64xf32>
    %24 = vector.shape_cast %23 : vector<64xf32> to vector<64x1xf32>
    %c0_11 = arith.constant 0 : index
    %c0_12 = arith.constant 0 : index
    %25 = vector.load %arg2[%c0_11, %c0_12] : memref<32x64xf32, #tpu.memory_space<vmem>>, vector<32x64xf32>
    %cst_13 = arith.constant dense<0.000000e+00> : vector<32x1xf32>
    %26 = tpu.matmul %25, %24, %cst_13 {dimension_numbers = #tpu.dot_dimension_numbers<[1], [0], [0], [1], [0, 0, 1, 1], [], []>} : vector<32x64xf32>, vector<64x1xf32>, vector<32x1xf32> -> vector<32x1xf32>
    %c0_14 = arith.constant 0 : index
    %c0_15 = arith.constant 0 : index
    %27 = vector.load %arg3[%c0_14, %c0_15] : memref<32x1xf32, #tpu.memory_space<vmem>>, vector<32x1xf32>
    %28 = arith.addf %26, %27 : vector<32x1xf32>
    %c0_16 = arith.constant 0 : index
    %c0_17 = arith.constant 0 : index
    %29 = vector.load %arg6[%c0_16, %c0_17] : memref<64x32xf32, #tpu.memory_space<vmem>>, vector<64x32xf32>
    %cst_18 = arith.constant dense<0.000000e+00> : vector<64x1xf32>
    %30 = tpu.matmul %29, %28, %cst_18 {dimension_numbers = #tpu.dot_dimension_numbers<[1], [0], [0], [1], [0, 0, 1, 1], [], []>} : vector<64x32xf32>, vector<32x1xf32>, vector<64x1xf32> -> vector<64x1xf32>
    %c0_19 = arith.constant 0 : index
    %c0_20 = arith.constant 0 : index
    %31 = vector.load %arg7[%c0_19, %c0_20] : memref<64x1xf32, #tpu.memory_space<vmem>>, vector<64x1xf32>
    %32 = arith.addf %30, %31 : vector<64x1xf32>
    %33 = arith.negf %32 : vector<64x1xf32>
    %34 = math.exp %33 : vector<64x1xf32>
    %cst_21 = arith.constant 1.000000e+00 : f32
    %35 = vector.broadcast %cst_21 : f32 to vector<64x1xf32>
    %36 = arith.addf %35, %34 : vector<64x1xf32>
    %37 = arith.divf %35, %36 : vector<64x1xf32>
    %38 = vector.broadcast %37 : vector<64x1xf32> to vector<64x256xf32>
    %39 = arith.mulf %38, %1 : vector<64x256xf32>
    %40 = arith.mulf %37, %20 : vector<64x1xf32>
    %c0_22 = arith.constant 0 : index
    %c0_23 = arith.constant 0 : index
    %41 = vector.load %arg10[%c0_22, %c0_23] : memref<32x64xf32, #tpu.memory_space<vmem>>, vector<32x64xf32>
    %cst_24 = arith.constant dense<0.000000e+00> : vector<32x1xf32>
    %42 = tpu.matmul %41, %40, %cst_24 {dimension_numbers = #tpu.dot_dimension_numbers<[1], [0], [0], [1], [0, 0, 1, 1], [], []>} : vector<32x64xf32>, vector<64x1xf32>, vector<32x1xf32> -> vector<32x1xf32>
    %c0_25 = arith.constant 0 : index
    %c0_26 = arith.constant 0 : index
    %43 = vector.load %arg11[%c0_25, %c0_26] : memref<32x1xf32, #tpu.memory_space<vmem>>, vector<32x1xf32>
    %44 = arith.addf %42, %43 : vector<32x1xf32>
    %cst_27 = arith.constant dense<0xFF800000> : vector<1xf32>
    %45 = vector.multi_reduction <maximumf>, %44, %cst_27 [0] : vector<32x1xf32> to vector<1xf32>
    %46 = vector.shape_cast %45 : vector<1xf32> to vector<1x1xf32>
    %47 = vector.broadcast %46 : vector<1x1xf32> to vector<32x1xf32>
    %48 = arith.subf %44, %47 : vector<32x1xf32>
    %49 = math.exp %48 : vector<32x1xf32>
    %cst_28 = arith.constant dense<0.000000e+00> : vector<1xf32>
    %50 = vector.multi_reduction <add>, %49, %cst_28 [0] : vector<32x1xf32> to vector<1xf32>
    %51 = vector.shape_cast %50 : vector<1xf32> to vector<1x1xf32>
    %52 = tpu.reciprocal %51 {approx = true} : vector<1x1xf32> -> vector<1x1xf32>
    %53 = vector.broadcast %52 : vector<1x1xf32> to vector<32x1xf32>
    %54 = arith.mulf %49, %53 : vector<32x1xf32>
    %c0_29 = arith.constant 0 : index
    %c0_30 = arith.constant 0 : index
    %55 = vector.load %arg8[%c0_29, %c0_30] : memref<32x64xf32, #tpu.memory_space<vmem>>, vector<32x64xf32>
    %56 = vector.broadcast %54 : vector<32x1xf32> to vector<32x64xf32>
    %57 = arith.mulf %55, %56 : vector<32x64xf32>
    %cst_31 = arith.constant dense<0.000000e+00> : vector<64xf32>
    %58 = vector.multi_reduction <add>, %57, %cst_31 [0] : vector<32x64xf32> to vector<64xf32>
    %59 = vector.shape_cast %58 : vector<64xf32> to vector<1x64xf32>
    %c0_32 = arith.constant 0 : index
    %c0_33 = arith.constant 0 : index
    %60 = vector.load %arg9[%c0_32, %c0_33] : memref<32x1xf32, #tpu.memory_space<vmem>>, vector<32x1xf32>
    %61 = arith.mulf %60, %54 : vector<32x1xf32>
    %cst_34 = arith.constant dense<0.000000e+00> : vector<1xf32>
    %62 = vector.multi_reduction <add>, %61, %cst_34 [0] : vector<32x1xf32> to vector<1xf32>
    %63 = vector.shape_cast %62 : vector<1xf32> to vector<1x1xf32>
    %cst_35 = arith.constant dense<0.000000e+00> : vector<1x256xf32>
    %64 = tpu.matmul %59, %39, %cst_35 {dimension_numbers = #tpu.dot_dimension_numbers<[1], [0], [0], [1], [0, 0, 1, 1], [], []>} : vector<1x64xf32>, vector<64x256xf32>, vector<1x256xf32> -> vector<1x256xf32>
    %65 = vector.broadcast %63 : vector<1x1xf32> to vector<1x256xf32>
    %66 = arith.addf %64, %65 : vector<1x256xf32>
    %67 = arith.negf %66 : vector<1x256xf32>
    %68 = math.exp %67 : vector<1x256xf32>
    %cst_36 = arith.constant 1.000000e+00 : f32
    %69 = vector.broadcast %cst_36 : f32 to vector<1x256xf32>
    %70 = arith.addf %69, %68 : vector<1x256xf32>
    %71 = arith.divf %69, %70 : vector<1x256xf32>
    %72 = vector.broadcast %71 : vector<1x256xf32> to vector<64x256xf32>
    %73 = arith.mulf %72, %39 : vector<64x256xf32>
    %c0_37 = arith.constant 0 : index
    %c0_38 = arith.constant 0 : index
    %c0_39 = arith.constant 0 : index
    %74 = vector.load %arg12[%c0_37, %c0_38, %c0_39] : memref<1x64x256xf32, #tpu.memory_space<vmem>>, vector<1x64x256xf32>
    %75 = vector.shape_cast %74 : vector<1x64x256xf32> to vector<64x256xf32>
    %76 = vector.shape_cast %73 : vector<64x256xf32> to vector<1x64x256xf32>
    tpu.vector_store %arg12[%c0_37, %c0_38, %c0_39], %76 {strides = array<i32>} : memref<1x64x256xf32, #tpu.memory_space<vmem>>, vector<1x64x256xf32>,
    return
  }
  func.func @transform_0(%arg0: i32) -> (i32, i32, i32) {
    %c0_i32 = arith.constant 0 : i32
    %c0_i32_0 = arith.constant 0 : i32
    %c0_i32_1 = arith.constant 0 : i32
    return %arg0, %c0_i32, %c0_i32_0 : i32, i32, i32
  }
  func.func @transform_1(%arg0: i32) -> (i32, i32) {
    %c0_i32 = arith.constant 0 : i32
    %c0_i32_0 = arith.constant 0 : i32
    %c0_i32_1 = arith.constant 0 : i32
    return %c0_i32, %c0_i32_0 : i32, i32
  }
  func.func @transform_2(%arg0: i32) -> (i32, i32) {
    %c0_i32 = arith.constant 0 : i32
    %c0_i32_0 = arith.constant 0 : i32
    %c0_i32_1 = arith.constant 0 : i32
    return %c0_i32, %c0_i32_0 : i32, i32
  }
  func.func @transform_3(%arg0: i32) -> (i32, i32) {
    %c0_i32 = arith.constant 0 : i32
    %c0_i32_0 = arith.constant 0 : i32
    %c0_i32_1 = arith.constant 0 : i32
    return %c0_i32, %c0_i32_0 : i32, i32
  }
  func.func @transform_4(%arg0: i32) -> (i32, i32) {
    %c0_i32 = arith.constant 0 : i32
    %c0_i32_0 = arith.constant 0 : i32
    %c0_i32_1 = arith.constant 0 : i32
    return %c0_i32, %c0_i32_0 : i32, i32
  }
  func.func @transform_5(%arg0: i32) -> (i32, i32) {
    %c0_i32 = arith.constant 0 : i32
    %c0_i32_0 = arith.constant 0 : i32
    %c0_i32_1 = arith.constant 0 : i32
    return %c0_i32, %c0_i32_0 : i32, i32
  }
  func.func @transform_6(%arg0: i32) -> (i32, i32) {
    %c0_i32 = arith.constant 0 : i32
    %c0_i32_0 = arith.constant 0 : i32
    %c0_i32_1 = arith.constant 0 : i32
    return %c0_i32, %c0_i32_0 : i32, i32
  }
  func.func @transform_7(%arg0: i32) -> (i32, i32) {
    %c0_i32 = arith.constant 0 : i32
    %c0_i32_0 = arith.constant 0 : i32
    %c0_i32_1 = arith.constant 0 : i32
    return %c0_i32, %c0_i32_0 : i32, i32
  }
  func.func @transform_8(%arg0: i32) -> (i32, i32) {
    %c0_i32 = arith.constant 0 : i32
    %c0_i32_0 = arith.constant 0 : i32
    %c0_i32_1 = arith.constant 0 : i32
    return %c0_i32, %c0_i32_0 : i32, i32
  }
  func.func @transform_9(%arg0: i32) -> (i32, i32) {
    %c0_i32 = arith.constant 0 : i32
    %c0_i32_0 = arith.constant 0 : i32
    %c0_i32_1 = arith.constant 0 : i32
    return %c0_i32, %c0_i32_0 : i32, i32
  }
  func.func @transform_10(%arg0: i32) -> (i32, i32) {
    %c0_i32 = arith.constant 0 : i32
    %c0_i32_0 = arith.constant 0 : i32
    %c0_i32_1 = arith.constant 0 : i32
    return %c0_i32, %c0_i32_0 : i32, i32
  }
  func.func @transform_11(%arg0: i32) -> (i32, i32, i32) {
    %c0_i32 = arith.constant 0 : i32
    %c0_i32_0 = arith.constant 0 : i32
    %c0_i32_1 = arith.constant 0 : i32
    return %arg0, %c0_i32, %c0_i32_0 : i32, i32, i32
  }
}

</mosaic_0001>

<bundles_post_ra>
// kernel: tpu_custom_call.1
= control target key start
LH: loop header
LB: loop body
LE: loop exit
PB: predicated region body
PF: predicated region fallthrough
CT: control target
= control target key end

     0   :  { %s2411_s0 = inlined_call_operand.vmem [shape: f32[2,64,256], index: 0, kind: input, shape index: {}]   ;;  %s2412_s1 = inlined_call_operand.hbm [shape: f32[32,64], index: 1, kind: input, shape index: {}]   ;;  %s2413_s2 = inlined_call_operand.vmem [shape: f32[32,1], index: 2, kind: input, shape index: {}]   ;;  %s2414_s3 = inlined_call_operand.vmem [shape: f32[1,64], index: 3, kind: input, shape index: {}]   ;;  %s2415_s4 = inlined_call_operand.<no memory space> [shape: f32[1,1], index: 4, kind: input, shape index: {}]   ;;  %s2416_s5 = inlined_call_operand.vmem [shape: f32[64,32], index: 5, kind: input, shape index: {}]   ;;  %s2417_s6 = inlined_call_operand.vmem [shape: f32[64,1], index: 6, kind: input, shape index: {}]   ;;  %s2418_s7 = inlined_call_operand.hbm [shape: f32[32,64], index: 7, kind: input, shape index: {}]   ;;  %s2419_s8 = inlined_call_operand.vmem [shape: f32[32,1], index: 8, kind: input, shape index: {}]   ;;  %s2420_s9 = inlined_call_operand.hbm [shape: f32[32,64], index: 9, kind: input, shape index: {}]   ;;  %s2421_s10 = inlined_call_operand.vmem [shape: f32[32,1], index: 10, kind: input, shape index: {}]   ;;  %s2422_s11 = inlined_call_operand.hbm [shape: f32[2,64,256], index: 11, kind: output, shape index: {}]  }
   0x1   :  { %v16_v0 = vstv %s2415_s4 }
   0x2   :  { %17 = vst [vmem:[#allocation2] sm:$0x1] %v16_v0 }
   0x3   :  { %18 = vsyncpa [#allocation4], 0 }
   0x4   :  { %19 = vsyncpa [#allocation7], 0 }
   0x5   :  { %20 = vsyncpa [#allocation5], 0 }
   0x6   :  { %22 = vsyncpa [#allocation5 + $0x1], 0  ;;  %s1948_s19 = smov 0   ;;  %s1950_s20 = smov 0  }
   0x7   :  { %s1952_s21 = smov 0   ;;  %s1954_s22 = smov 0  }
   0x8 LB: > { %s1969_s4 = sadd.s32 4294967295, %s1873_s22   ;;  %s1445_s23 = sadd.s32 4294967294, %s1873_s22   ;;  %s1873_s22 = sphi %s1954_s22, %s2440_s22   ;;  %s1869_s21 = sphi %s1952_s21, %s2439_s21   ;;  %s1865_s20 = sphi %s1950_s20, %s2438_s20   ;;  %s1861_s19 = sphi %s1948_s19, %s2437_s19  }
   0x9   : > { %s1973_s24 = sadd.s32 1, %s1873_s22   ;;  %s271_s25 = sadd.s32 1, %s1869_s21 }
   0xa   : > { %s268_s26 = ssub.s32 %s1873_s22, %s1973_s24  ;;  %p281_p0 = scmp.ne.s32.totalorder %s1869_s21, %s1865_s20 }
   0xb   : > { %p269_p1 = scmp.eq.s32.totalorder %s268_s26, 0  ;;  %p282_p2 = scmp.eq.s32.totalorder %s1969_s4, 1 }
   0xc   : > { %p287_p3 = scmp.ne.s32.totalorder %s1865_s20, %s1861_s19  ;;  %p288_p4 = scmp.eq.s32.totalorder %s1445_s23, 1 }
   0xd   : > { %s1984_s27 = scalar_select %p269_p1, %s1869_s21, %s271_s25  }
   0xe   : > { %p1986_p5 = por %p282_p2, %p281_p0  ;;  %p1990_p6 = por %p288_p4, %p287_p3 }
   0xf   : > { %2425 = sst [smem:[#allocation13_spill]] %s1984_s27  ;;  %p1446_p7 = scmp.ge.s32.totalorder %s1873_s22, 1 }
  0x10   : > { %s2426_s28 = scalar_select %p1986_p5, 1, 0 }
  0x11   : > { %s2427_s29 = scalar_select %p1990_p6, 1, 0 }
  0x12   : > { %p295_p8 = scmp.lt.s32.totalorder %s1873_s22, 3  ;;  %p2423_p9 = scmp.eq.s32.totalorder %s1969_s4, 0 }
  0x13   : > { %s1875_s12 = smov [#allocation6]   ;;  %s1876_s15 = smov [#allocation3]  }
  0x14   : > { %p1997_p10 = pnand %p1446_p7, %p295_p8  ;;  %s335_s13 = sshll.u32 %s1875_s12, 4  ;;  %s336_s13 = int_to_ptr.vmem [resolvable:$true] %s335_s13 }
  0x15   : > { %s307_s16 = sshll.u32 %s1876_s15, 4  ;;  %s1877_s17 = smov [#allocation8]   ;;  %s308_s16 = int_to_ptr.vmem [resolvable:$true] %s307_s16 }
  0x16   : > { %p1607_p11 = pneg %p1997_p10  ;;  %s351_s18 = sshll.u32 %s1877_s17, 4  ;;  %s352_s18 = int_to_ptr.vmem [resolvable:$true] %s351_s18 }
  0x17   : > { %s1738_s23 = scalar_lea.vmem %s336_s13, 512  ;;  %p1746_p3 = scmp.lt.s32.totalorder %s336_s13, %s336_s13 }
  0x18   : > { %p2005_p12 = pnand %p2423_p9, %p1607_p11  ;;  %p1739_p0 = scmp.ne.s32.totalorder %s336_s13, %s1738_s23 }
  0x19   : > { %p1747_p4 = scmp.lt.s32.totalorder %s1738_s23, %s1738_s23 }
  0x1a   : > { %p1729_p13 = pneg %p2005_p12 }
  0x1b   : > { %p1748_p7 = por %p1747_p4, %p1746_p3 }
  0x1c   : > { %p1741_p1 = pnand %p1739_p0, %p1729_p13 }
  0x1e   : > { %p1742_p2 = pneg %p1741_p1 }
  0x20   : > { %p1749_p8 = pnand %p1748_p7, %p1742_p2 }
  0x22   : > { %1752 = shalt.err (!%p1749_p8)
}
  0x23   : > { %s1878_s25 = smov 128   ;;  %s1879_s26 = smov 8  }
  0x24   : > { %1613 = dma.hbm_to_vmem [thread:$0]  (!%p2005_p12), %s2418_s7, 512, %s336_s13, [#allocation7], %s1878_s25, %s1878_s25, %s1879_s26  }
  0x25   : > { %s1764_s17 = scalar_lea.vmem %s308_s16, 512  ;;  %p1772_p9 = scmp.lt.s32.totalorder %s308_s16, %s308_s16 }
  0x26   : > { %p1765_p11 = scmp.ne.s32.totalorder %s308_s16, %s1764_s17  ;;  %p1773_p6 = scmp.lt.s32.totalorder %s1764_s17, %s1764_s17 }
  0x28   : > { %p1767_p0 = pnand %p1765_p11, %p1729_p13  ;;  %p1774_p3 = por %p1773_p6, %p1772_p9 }
  0x2a   : > { %p1768_p1 = pneg %p1767_p0 }
  0x2c   : > { %p1775_p2 = pnand %p1774_p3, %p1768_p1 }
  0x2e   : > { %1778 = shalt.err (!%p1775_p2)
}
  0x2f   : > { %1610 = dma.hbm_to_vmem [thread:$0]  (!%p2005_p12), %s2412_s1, 512, %s308_s16, [#allocation4], %s1878_s25, %s1878_s25, %s1879_s26  }
  0x30   : > { %s1790_s13 = scalar_lea.vmem %s352_s18, 512  ;;  %p1798_p11 = scmp.lt.s32.totalorder %s352_s18, %s352_s18 }
  0x31   : > { %p1791_p4 = scmp.ne.s32.totalorder %s352_s18, %s1790_s13  ;;  %p1799_p0 = scmp.lt.s32.totalorder %s1790_s13, %s1790_s13 }
  0x33   : > { %p1793_p7 = pnand %p1791_p4, %p1729_p13  ;;  %p1800_p5 = por %p1799_p0, %p1798_p11 }
  0x35   : > { %p1794_p8 = pneg %p1793_p7 }
  0x37   : > { %p1801_p6 = pnand %p1800_p5, %p1794_p8 }
  0x39   : > { %1804 = shalt.err (!%p1801_p6)
}
  0x3a   : > { %1616 = dma.hbm_to_vmem [thread:$0]  (!%p2005_p12), %s2420_s9, 512, %s352_s18, [#allocation7], %s1878_s25, %s1878_s25, %s1879_s26  }
  0x3b   : > { %378 = sbr.rel (%p1997_p10) target bundleno = 1918 (0x77e), region = 64  ;;  %p2430_p9 = scmp.eq.s32.totalorder (!%p1997_p10), %s1969_s4, 0 }
  0x40   : > { %1848 = dma.done.wait (%p2430_p9), [#allocation4], 512   ;;  %p2431_p13 = pmov %p2430_p9 }
  0x41   : > { %p2432_p1 = pmov %p2430_p9 }
  0x42   : > { %1850 = vsyncadd (%p2431_p13), [#allocation4], 4294966784 }
  0x43   : > { %1852 = dma.done.wait (%p2432_p1), [#allocation7], 1024   ;;  %p2433_p5 = pmov %p2432_p1 }
  0x44   : > { %p426_p3 = scmp.lt.s32.totalorder %s1969_s4, 1  ;;  %v1880_v1 = vmov 0.0   ;;  %v1881_v2 = vmov 0   ;;  %v448_v11 = vld [vmem:[#allocation2] sm:$0x1]  ;;  %vm458_vm0 = vcmask 523264   ;;  %v454_v21 = vlaneseq }
  0x45   : > { %1854 = vsyncadd (%p2433_p5), [#allocation7], 4294966272  ;;  %526 = vmatprep.mubr.f32.mxu0 %v1880_v1  ;;  %1669 = vset.pattern.permute.xlu0 %v1881_v2  ;;  %v447_v20 = vld [vmem:[%s2414_s3] sm:$0x1]  ;;  %vm533_vm1 = vcmask 1040384   ;;  %vm754_vm2 = vcmask 261120  }
  0x46   : > { %s427_s27 = scalar_select %p426_p3, %s1969_s4, 1  ;;  %1670 = vset.pattern.permute.xlu1 %v1881_v2  ;;  %451 = vperm.xlu0 %1669, %v448_v11   ;;  %v455_v22 = vshrl.u32 %v454_v21, 7  ;;  %vm1101_vm3 = vcmask 7168  }
  0x47   : > { %s423_s16 = sand.u32 1, %s1865_s20   ;;  %s1492_s25 = sshll.u32 %s1969_s4, 11 }
  0x48   : > { %s1491_s30 = sshll.u32 %s427_s27, 7  ;;  %v2121_v23 = vsub.s32 0, %v455_v22  ;;  %s2361_s13 = scalar_lea.hbm %s2422_s11, %s1492_s25 }
  0x49   : > { %s2051_s18 = scalar_lea.vmem %s2411_s0, %s1491_s30  ;;  %s2371_s12 = scalar_lea.sflag [#allocation5], %s423_s16 }
  0x4a   : > { %v2054_v3 = vld [vmem:[%s2051_s18 + $0x78] sm:$0xff]  ;;  %v2057_v4 = vld [vmem:[%s2051_s18 + $0x70] sm:$0xff]  ;;  %v2060_v5 = vld [vmem:[%s2051_s18 + $0x68] sm:$0xff]  ;;  %p2434_p12 = scmp.ne.s32.totalorder %s2426_s28, 0  ;;  %s1882_s27 = smov [#allocation9]  }
  0x4b   : > { %478 = vmatprep.subr.mxu0 %v2054_v3  ;;  %v2064_v6 = vld [vmem:[%s2051_s18 + $0x60] sm:$0xff]  ;;  %v2068_v7 = vld [vmem:[%s2051_s18 + $0x58] sm:$0xff]  ;;  %v2072_v8 = vld [vmem:[%s2051_s18 + $0x50] sm:$0xff]  ;;  %s1809_s30 = sshll.u32 %s1882_s27, 4  ;;  %s1810_s30 = int_to_ptr.vmem [resolvable:$false] %s1809_s30 }
  0x4c   : > { %479 = vmatpush1.msra.mxu0 %v2057_v4  ;;  %v2076_v9 = vld [vmem:[%s2051_s18 + $0x48] sm:$0xff]  ;;  %v2080_v10 = vld [vmem:[%s2051_s18 + $0x40] sm:$0xff]  ;;  %v2084_v12 = vld [vmem:[%s2051_s18 + $0x38] sm:$0xff]  ;;  %s1811_s14 = scalar_lea.vmem %s1810_s30, 4096 }
  0x4d   : > { %480 = vmatprep.subr.mxu0 %v2060_v5  ;;  %v2088_v13 = vld [vmem:[%s2051_s18 + $0x30] sm:$0xff]  ;;  %v2092_v14 = vld [vmem:[%s2051_s18 + $0x28] sm:$0xff]  ;;  %v2096_v15 = vld [vmem:[%s2051_s18 + $0x20] sm:$0xff] }
  0x4e   : > { %481 = vmatpush1.msra.mxu0 %v2064_v6  ;;  %v2100_v16 = vld [vmem:[%s2051_s18 + $0x18] sm:$0xff]  ;;  %v2104_v17 = vld [vmem:[%s2051_s18 + $0x10] sm:$0xff]  ;;  %v2108_v18 = vld [vmem:[%s2051_s18 + $0x8] sm:$0xff] }
  0x4f   : > { %482 = vmatprep.subr.mxu0 %v2068_v7  ;;  %v2112_v19 = vld [vmem:[%s2051_s18] sm:$0xff]  ;;  %s1455_s18 = sshll.u32 %s423_s16, 7 }
  0x50   : > { %483 = vmatpush1.msra.mxu0 %v2072_v8  ;;  %s425_s26 = scalar_lea.vmem [#allocation9], %s1455_s18 }
  0x51   : > { %484 = vmatprep.subr.mxu0 %v2076_v9  ;;  %s1352_s17 = sshll.u32 %s425_s26, 4  ;;  %s2363_s17 = int_to_ptr.vmem [resolvable:$true] %s1352_s17 }
  0x52   : > { %485 = vmatpush1.msra.mxu0 %v2080_v10  ;;  %s1805_s15 = scalar_lea.vmem %s2363_s17, 2048  ;;  %p1812_p7 = scmp.lt.s32.totalorder %s2363_s17, %s1810_s30 }
  0x53   : > { %486 = vmatprep.subr.mxu0 %v2084_v12  ;;  %p1806_p10 = scmp.ne.s32.totalorder %s2363_s17, %s1805_s15  ;;  %p1813_p8 = scmp.lt.s32.totalorder %s1811_s14, %s1805_s15 }
  0x54   : > { %487 = vmatpush1.msra.mxu0 %v2088_v13 }
  0x55   : > { %488 = vmatprep.subr.mxu0 %v2092_v14  ;;  %p1807_p2 = pnand %p1806_p10, %p2434_p12  ;;  %p1814_p11 = por %p1813_p8, %p1812_p7 }
  0x56   : > { %489 = vmatpush1.msra.mxu0 %v2096_v15 }
  0x57   : > { %490 = vmatprep.subr.mxu0 %v2100_v16  ;;  %p1808_p4 = pneg %p1807_p2 }
  0x58   : > { %491 = vmatpush1.msra.mxu0 %v2104_v17 }
  0x59   : > { %492 = vmatprep.subr.mxu0 %v2108_v18  ;;  %p1815_p0 = pnand %p1814_p11, %p1808_p4 }
  0x5a   : > { %493 = vmatpush1.msra.mxu0 %v2112_v19 }
  0x5b   : > { %1458 = vmatmul.mubr.msk.f32.vlgmr.msra.gmra.mxu0 %vm458_vm0, %v447_v20 }
  0xc1   : > { %v452_v24 = vpop.permute.xlu0 %451 }
  0xc2   : > { %v457_v25 = vrot.slane %v452_v24, %v2121_v23 }
 0x11b   : > { %v528_v26 = vpop.f32.mrf.mxu0 }
 0x11c   : > { %v529_v27 = vadd.f32 %v528_v26, %v457_v25 }
 0x11d   : > { %v530_v28 = vpop.f32.mrf.mxu0 }
 0x11e   : > { %v531_v29 = vadd.f32 %v530_v28, %v457_v25  ;;  %v534_v30 = vsel %vm533_vm1, %v529_v27, -inf }
 0x120   : > { %v535_v31 = vsel %vm533_vm1, %v531_v29, -inf }
 0x121   : > { %v536_v32 = vmax.f32 %v534_v30, %v535_v31 }
 0x123   : > { %537 = vmax.xlane.f32.xlu0 %v536_v32 }
 0x1ac   : > { %v538_v33 = vpop.xlane.xlu0 %537 }
 0x1ad   : > { %v539_v34 = vsub.f32 %v529_v27, %v538_v33  ;;  %v540_v35 = vsub.f32 %v531_v29, %v538_v33  ;;  %v633_v27 = vld [vmem:[#allocation3] sm:$0xff] }
 0x1ae   : > { %1545 = vmatprep.mubr.msk.f32.mxu1 %vm458_vm0, %v633_v27  ;;  %v749_v27 = vld [vmem:[%s2417_s6 + $0x18] sm:$0xff] }
 0x1af   : > { %v541_v36 = vmul.f32 1.442695, %v539_v34  ;;  %v543_v37 = vmul.f32 1.442695, %v540_v35 }
 0x1b1   : > { %1671 = vpow2.f32 %v541_v36  ;;  %v634_v36 = vld [vmem:[#allocation3 + $0x8] sm:$0xff] }
 0x1b2   : > { %1673 = vpow2.f32 %v543_v37  ;;  %v635_v37 = vld [vmem:[#allocation3 + $0x10] sm:$0xff] }
 0x1be   : > { %v1672_v38 = vpop.eup %1671 }
 0x1bf   : > { %v1674_v39 = vpop.eup %1673  ;;  %v545_v40 = vsel %vm533_vm1, %v1672_v38, 0.0 }
 0x1c0   : > { %v546_v41 = vsel %vm533_vm1, %v1674_v39, 0.0 }
 0x1c1   : > { %v547_v42 = vadd.f32 %v546_v41, %v545_v40  ;;  %v574_v40 = vadd.f32 %v2054_v3, %v2057_v4  ;;  %v571_v41 = vadd.f32 %v2060_v5, %v2064_v6 }
 0x1c3   : > { %548 = vadd.xlane.f32.xlu1 %v547_v42  ;;  %575 = vadd.xlane.f32.xlu0 %v574_v40  ;;  %v568_v42 = vadd.f32 %v2068_v7, %v2072_v8 }
 0x1c7   : > { %569 = vadd.xlane.f32.xlu0 %v568_v42  ;;  %v746_v42 = vld [vmem:[%s2417_s6] sm:$0xff] }
 0x24c   : > { %v549_v43 = vpop.xlane.xlu1 %548 }
 0x24d   : > { %1675 = vrcp.f32 %v549_v43  ;;  %v565_v43 = vadd.f32 %v2076_v9, %v2080_v10 }
 0x25a   : > { %v1676_v44 = vpop.eup %1675 }
 0x25b   : > { %v551_v45 = vmul.f32 %v1676_v44, %v1672_v38  ;;  %v552_v46 = vmul.f32 %v1676_v44, %v1674_v39  ;;  %v636_v38 = vld [vmem:[#allocation3 + $0x18] sm:$0xff]  ;;  %v562_v44 = vadd.f32 %v2084_v12, %v2088_v13 }
 0x25c   : > { %v738_v39 = vld [vmem:[%s2416_s5] sm:$0xff] }
 0x25d   : > { %v588_v47 = vrot.slane %v551_v45, %v2121_v23  ;;  %v592_v48 = vrot.slane %v552_v46, %v2121_v23  ;;  %1559 = vmatprep.mubr.msk.f32.mxu0 %vm754_vm2, %v738_v39  ;;  %v559_v45 = vadd.f32 %v2092_v14, %v2096_v15  ;;  %563 = vadd.xlane.f32.xlu0 %v562_v44 }
 0x25e   : > { %v556_v46 = vadd.f32 %v2100_v16, %v2104_v17 }
 0x25f   : > { %v607_v49 = vmul.f32 %v588_v47, %v2057_v4  ;;  %v608_v50 = vmul.f32 %v592_v48, %v2054_v3  ;;  %v605_v52 = vmul.f32 %v588_v47, %v2064_v6  ;;  %v606_v53 = vmul.f32 %v592_v48, %v2060_v5 }
 0x260   : > { %v603_v55 = vmul.f32 %v588_v47, %v2072_v8  ;;  %v604_v56 = vmul.f32 %v592_v48, %v2068_v7  ;;  %v601_v58 = vmul.f32 %v588_v47, %v2080_v10  ;;  %v602_v59 = vmul.f32 %v592_v48, %v2076_v9 }
 0x261   : > { %v630_v51 = vadd.f32 %v608_v50, %v607_v49  ;;  %v627_v54 = vadd.f32 %v606_v53, %v605_v52  ;;  %v599_v61 = vmul.f32 %v588_v47, %v2088_v13  ;;  %v600_v62 = vmul.f32 %v592_v48, %v2084_v12  ;;  %557 = vadd.xlane.f32.xlu0 %v556_v46  ;;  %v640_v50 = vld [vmem:[%s2413_s2 + $0x18] sm:$0xff]  ;;  %v639_v52 = vld [vmem:[%s2413_s2 + $0x10] sm:$0xff] }
 0x262   : > { %v624_v57 = vadd.f32 %v604_v56, %v603_v55  ;;  %v621_v60 = vadd.f32 %v602_v59, %v601_v58  ;;  %v597_v0 = vmul.f32 %v588_v47, %v2096_v15  ;;  %v598_v2 = vmul.f32 %v592_v48, %v2092_v14 }
 0x263   : > { %631 = vadd.xlane.f32.xlu1 %v630_v51  ;;  %v618_v63 = vadd.f32 %v600_v62, %v599_v61  ;;  %v595_v20 = vmul.f32 %v588_v47, %v2104_v17  ;;  %v596_v21 = vmul.f32 %v592_v48, %v2100_v16  ;;  %v593_v24 = vmul.f32 %v588_v47, %v2112_v19  ;;  %v740_v61 = vld [vmem:[%s2416_s5 + $0x10] sm:$0xff]  ;;  %v741_v62 = vld [vmem:[%s2416_s5 + $0x18] sm:$0xff] }
 0x264   : > { %v615_v11 = vadd.f32 %v598_v2, %v597_v0  ;;  %v594_v25 = vmul.f32 %v592_v48, %v2108_v18  ;;  %v553_v47 = vadd.f32 %v2108_v18, %v2112_v19  ;;  %v743_v0 = vld [vmem:[%s2416_s5 + $0x28] sm:$0xff]  ;;  %v744_v2 = vld [vmem:[%s2416_s5 + $0x30] sm:$0xff] }
 0x265   : > { %v612_v22 = vadd.f32 %v596_v21, %v595_v20  ;;  %v996_v20 = vld [vmem:[#allocation8] sm:$0xff] }
 0x266   : > { %v609_v26 = vadd.f32 %v594_v25, %v593_v24 }
 0x267   : > { %628 = vadd.xlane.f32.xlu1 %v627_v54  ;;  %v638_v54 = vld [vmem:[%s2413_s2 + $0x8] sm:$0xff] }
 0x26b   : > { %625 = vadd.xlane.f32.xlu1 %v624_v57  ;;  %v637_v57 = vld [vmem:[%s2413_s2] sm:$0xff] }
 0x26f   : > { %622 = vadd.xlane.f32.xlu1 %v621_v60  ;;  %v739_v60 = vld [vmem:[%s2416_s5 + $0x8] sm:$0xff] }
 0x273   : > { %619 = vadd.xlane.f32.xlu1 %v618_v63  ;;  %v742_v63 = vld [vmem:[%s2416_s5 + $0x20] sm:$0xff] }
 0x277   : > { %616 = vadd.xlane.f32.xlu1 %v615_v11  ;;  %v745_v11 = vld [vmem:[%s2416_s5 + $0x38] sm:$0xff] }
 0x27b   : > { %613 = vadd.xlane.f32.xlu1 %v612_v22 }
 0x27f   : > { %610 = vadd.xlane.f32.xlu1 %v609_v26  ;;  %v751_v26 = vld [vmem:[%s2417_s6 + $0x28] sm:$0xff] }
 0x283   : > { %572 = vadd.xlane.f32.xlu1 %v571_v41 }
 0x287   : > { %566 = vadd.xlane.f32.xlu1 %v565_v43 }
 0x28b   : > { %560 = vadd.xlane.f32.xlu1 %v559_v45 }
 0x28f   : > { %554 = vadd.xlane.f32.xlu1 %v553_v47 }
 0x2ec   : > { %v632_v28 = vpop.xlane.xlu1 %631 }
 0x2ed   : > { %1529 = vmatprep.subr.mxu1 %v632_v28 }
 0x2ee   : > { %1530 = vmatpush3.msra.mxu1 %v632_v28 }
 0x2f0   : > { %v629_v29 = vpop.xlane.xlu1 %628 }
 0x2f1   : > { %1531 = vmatprep.subr.mxu1 %v629_v29 }
 0x2f2   : > { %1532 = vmatpush3.msra.mxu1 %v629_v29 }
 0x2f4   : > { %v626_v30 = vpop.xlane.xlu1 %625 }
 0x2f5   : > { %1533 = vmatprep.subr.mxu1 %v626_v30 }
 0x2f6   : > { %1534 = vmatpush3.msra.mxu1 %v626_v30 }
 0x2f8   : > { %v623_v31 = vpop.xlane.xlu1 %622 }
 0x2f9   : > { %1535 = vmatprep.subr.mxu1 %v623_v31 }
 0x2fa   : > { %1536 = vmatpush3.msra.mxu1 %v623_v31  ;;  %v748_v31 = vld [vmem:[%s2417_s6 + $0x10] sm:$0xff] }
 0x2fc   : > { %v620_v32 = vpop.xlane.xlu1 %619 }
 0x2fd   : > { %1537 = vmatprep.subr.mxu1 %v620_v32 }
 0x2fe   : > { %1538 = vmatpush3.msra.mxu1 %v620_v32 }
 0x300   : > { %v617_v33 = vpop.xlane.xlu1 %616 }
 0x301   : > { %1539 = vmatprep.subr.mxu1 %v617_v33 }
 0x302   : > { %1540 = vmatpush3.msra.mxu1 %v617_v33  ;;  %v753_v33 = vld [vmem:[%s2417_s6 + $0x38] sm:$0xff] }
 0x304   : > { %v614_v34 = vpop.xlane.xlu1 %613 }
 0x305   : > { %1541 = vmatprep.subr.mxu1 %v614_v34 }
 0x306   : > { %1542 = vmatpush3.msra.mxu1 %v614_v34 }
 0x308   : > { %v611_v35 = vpop.xlane.xlu1 %610 }
 0x309   : > { %1543 = vmatprep.subr.mxu1 %v611_v35 }
 0x30a   : > { %1544 = vmatpush3.msra.mxu1 %v611_v35 }
 0x30b   : > { %1546 = vmatmul.mubr.msk.f32.vlgmr.msra.gmra.mxu1 %vm458_vm0, %v634_v36  ;;  %v747_v36 = vld [vmem:[%s2417_s6 + $0x8] sm:$0xff] }
 0x30c   : > { %1548 = vmatprep.mubr.msk.f32.mxu1 %vm458_vm0, %v635_v37 }
 0x30f   : > { %1549 = vmatmul.mubr.msk.f32.gmra.mxu1 %vm458_vm0, %v636_v38  ;;  %v752_v38 = vld [vmem:[%s2417_s6 + $0x30] sm:$0xff] }
 0x310   : > { %1587 = vmatprep.mubr.msk.f32.mxu1 %vm458_vm0, %v996_v20 }
 0x3cb   : > { %v1547_v48 = vpop.f32.mrf.mxu1 }
 0x3cc   : > { %v725_v58 = vadd.f32 %v1547_v48, %v638_v54 }
 0x3cd   : > { %v719_v49 = vpop.f32.mrf.mxu1 }
 0x3ce   : > { %v720_v59 = vadd.f32 %v719_v49, %v637_v57 }
 0x3cf   : > { %v1550_v51 = vpop.f32.mrf.mxu1 }
 0x3d0   : > { %v735_v53 = vadd.f32 %v1550_v51, %v640_v50 }
 0x3d1   : > { %v729_v55 = vpop.f32.mrf.mxu1 }
 0x3d2   : > { %v730_v56 = vadd.f32 %v729_v55, %v639_v52  ;;  %1551 = vmatprep.subr.mxu0 %v735_v53 }
 0x3d3   : > { %1552 = vmatpush3.msra.mxu0 %v735_v53 }
 0x3d4   : > { %1553 = vmatprep.subr.mxu0 %v730_v56 }
 0x3d5   : > { %1554 = vmatpush3.msra.mxu0 %v730_v56 }
 0x3d6   : > { %1555 = vmatprep.subr.mxu0 %v725_v58 }
 0x3d7   : > { %1556 = vmatpush3.msra.mxu0 %v725_v58 }
 0x3d8   : > { %1557 = vmatprep.subr.mxu0 %v720_v59 }
 0x3d9   : > { %1558 = vmatpush3.msra.mxu0 %v720_v59 }
 0x3da   : > { %1560 = vmatmul.mubr.msk.f32.vlgmr.msra.gmra.mxu0 %vm754_vm2, %v739_v60 }
 0x3db   : > { %1562 = vmatprep.mubr.msk.f32.mxu0 %vm754_vm2, %v740_v61 }
 0x3de   : > { %1563 = vmatmul.mubr.msk.f32.gmra.mxu0 %vm754_vm2, %v741_v62 }
 0x3df   : > { %1565 = vmatprep.mubr.msk.f32.mxu0 %vm754_vm2, %v742_v63  ;;  %v576_v63 = vpop.xlane.xlu0 %575 }
 0x3e2   : > { %1566 = vmatmul.mubr.msk.f32.gmra.mxu0 %vm754_vm2, %v743_v0 }
 0x3e3   : > { %1568 = vmatprep.mubr.msk.f32.mxu0 %vm754_vm2, %v744_v2 }
 0x3e6   : > { %1569 = vmatmul.mubr.msk.f32.gmra.mxu0 %vm754_vm2, %v745_v11  ;;  %v573_v11 = vpop.xlane.xlu1 %572 }
 0x3e7   : > { %1279 = vmatprep.mubr.f32.mxu0 %v1880_v1  ;;  %v750_v1 = vld [vmem:[%s2417_s6 + $0x20] sm:$0xff] }
 0x49a   : > { %v1561_v21 = vpop.f32.mrf.mxu0 }
 0x49b   : > { %v851_v45 = vadd.f32 %v1561_v21, %v747_v36 }
 0x49c   : > { %v845_v22 = vpop.f32.mrf.mxu0 }
 0x49d   : > { %v846_v48 = vadd.f32 %v845_v22, %v746_v42  ;;  %v1472_v51 = vmul.f32 -1.442695, %v851_v45 }
 0x49e   : > { %v1564_v24 = vpop.f32.mrf.mxu0 }
 0x49f   : > { %v861_v30 = vadd.f32 %v1564_v24, %v749_v27  ;;  %v1471_v52 = vmul.f32 -1.442695, %v846_v48  ;;  %v570_v24 = vpop.xlane.xlu0 %569  ;;  %v584_v27 = vmul.f32 0.00390625, %v576_v63 }
 0x4a0   : > { %v855_v25 = vpop.f32.mrf.mxu0 }
 0x4a1   : > { %v856_v39 = vadd.f32 %v855_v25, %v748_v31  ;;  %v1474_v43 = vmul.f32 -1.442695, %v861_v30 }
 0x4a2   : > { %v1567_v28 = vpop.f32.mrf.mxu0 }
 0x4a3   : > { %v871_v29 = vadd.f32 %v1567_v28, %v751_v26  ;;  %v1473_v49 = vmul.f32 -1.442695, %v856_v39  ;;  %v567_v26 = vpop.xlane.xlu1 %566  ;;  %v583_v28 = vmul.f32 0.00390625, %v573_v11 }
 0x4a4   : > { %v865_v32 = vpop.f32.mrf.mxu0  ;;  %v581_v36 = vmul.f32 0.00390625, %v567_v26 }
 0x4a5   : > { %v1476_v34 = vmul.f32 -1.442695, %v871_v29  ;;  %v866_v35 = vadd.f32 %v865_v32, %v750_v1  ;;  %v564_v29 = vpop.xlane.xlu0 %563  ;;  %v582_v32 = vmul.f32 0.00390625, %v570_v24 }
 0x4a6   : > { %v1570_v37 = vpop.f32.mrf.mxu0  ;;  %v580_v39 = vmul.f32 0.00390625, %v564_v29 }
 0x4a7   : > { %v1475_v40 = vmul.f32 -1.442695, %v866_v35  ;;  %v881_v41 = vadd.f32 %v1570_v37, %v753_v33  ;;  %1677 = vpow2.f32 %v1476_v34  ;;  %v561_v34 = vpop.xlane.xlu1 %560 }
 0x4a8   : > { %v875_v44 = vpop.f32.mrf.mxu0 }
 0x4a9   : > { %v1478_v46 = vmul.f32 -1.442695, %v881_v41  ;;  %v876_v47 = vadd.f32 %v875_v44, %v752_v38  ;;  %1679 = vpow2.f32 %v1475_v40  ;;  %v558_v41 = vpop.xlane.xlu0 %557 }
 0x4ab   : > { %1681 = vpow2.f32 %v1478_v46  ;;  %v1477_v50 = vmul.f32 -1.442695, %v876_v47  ;;  %v555_v45 = vpop.xlane.xlu1 %554  ;;  %v578_v47 = vmul.f32 0.00390625, %v558_v41 }
 0x4ac   : > { %1683 = vpow2.f32 %v1474_v43  ;;  %v579_v43 = vmul.f32 0.00390625, %v561_v34 }
 0x4ad   : > { %1685 = vpow2.f32 %v1477_v50  ;;  %v577_v50 = vmul.f32 0.00390625, %v555_v45 }
 0x4ae   : > { %1687 = vpow2.f32 %v1473_v49 }
 0x4af   : > { %1689 = vpow2.f32 %v1472_v51 }
 0x4b0   : > { %1691 = vpow2.f32 %v1471_v52 }
 0x4b4   : > { %v1678_v53 = vpop.eup %1677 }
 0x4b5   : > { %v913_v56 = vadd.f32 1.0, %v1678_v53 }
 0x4b6   : > { %v1680_v54 = vpop.eup %1679 }
 0x4b7   : > { %v912_v60 = vadd.f32 1.0, %v1680_v54  ;;  %v997_v54 = vld [vmem:[#allocation8 + $0x8] sm:$0xff] }
 0x4b8   : > { %v1682_v55 = vpop.eup %1681 }
 0x4b9   : > { %v1684_v57 = vpop.eup %1683  ;;  %v915_v58 = vadd.f32 1.0, %v1682_v55  ;;  %v998_v55 = vld [vmem:[#allocation8 + $0x10] sm:$0xff] }
 0x4ba   : > { %v1686_v59 = vpop.eup %1685  ;;  %v911_v0 = vadd.f32 1.0, %v1684_v57 }
 0x4bb   : > { %1693 = vrcp.f32 %v915_v58  ;;  %v914_v61 = vadd.f32 1.0, %v1686_v59  ;;  %v1688_v62 = vpop.eup %1687  ;;  %v1000_v58 = vld [vmem:[%s2421_s10] sm:$0xff]  ;;  %v1001_v59 = vld [vmem:[%s2421_s10 + $0x8] sm:$0xff] }
 0x4bc   : > { %1695 = vrcp.f32 %v913_v56  ;;  %v1690_v2 = vpop.eup %1689  ;;  %v910_v20 = vadd.f32 1.0, %v1688_v62  ;;  %v999_v56 = vld [vmem:[#allocation8 + $0x18] sm:$0xff] }
 0x4bd   : > { %1697 = vrcp.f32 %v914_v61  ;;  %v1692_v21 = vpop.eup %1691  ;;  %v909_v22 = vadd.f32 1.0, %v1690_v2  ;;  %v1003_v61 = vld [vmem:[%s2421_s10 + $0x18] sm:$0xff] }
 0x4be   : > { %1699 = vrcp.f32 %v912_v60  ;;  %v908_v25 = vadd.f32 1.0, %v1692_v21 }
 0x4bf   : > { %1701 = vrcp.f32 %v911_v0  ;;  %v1002_v0 = vld [vmem:[%s2421_s10 + $0x10] sm:$0xff] }
 0x4c0   : > { %1703 = vrcp.f32 %v910_v20 }
 0x4c1   : > { %1705 = vrcp.f32 %v909_v22 }
 0x4c2   : > { %1707 = vrcp.f32 %v908_v25 }
 0x4c8   : > { %v2236_v1 = vpop.eup %1693 }
 0x4c9   : > { %v2238_v30 = vpop.eup %1695  ;;  %v995_v31 = vmul.f32 %v2236_v1, %v584_v27 }
 0x4ca   : > { %v2241_v33 = vpop.eup %1697  ;;  %v993_v38 = vmul.f32 %v2238_v30, %v582_v32 }
 0x4cb   : > { %v994_v35 = vmul.f32 %v2241_v33, %v583_v28  ;;  %1571 = vmatprep.subr.mxu1 %v995_v31  ;;  %v2244_v37 = vpop.eup %1699 }
 0x4cc   : > { %1572 = vmatpush3.msra.mxu1 %v995_v31  ;;  %v2247_v40 = vpop.eup %1701  ;;  %v992_v42 = vmul.f32 %v2244_v37, %v581_v36 }
 0x4cd   : > { %1573 = vmatprep.subr.mxu1 %v994_v35  ;;  %v2250_v44 = vpop.eup %1703  ;;  %v991_v46 = vmul.f32 %v2247_v40, %v580_v39 }
 0x4ce   : > { %1574 = vmatpush3.msra.mxu1 %v994_v35  ;;  %v2253_v48 = vpop.eup %1705  ;;  %v990_v49 = vmul.f32 %v2250_v44, %v579_v43 }
 0x4cf   : > { %1575 = vmatprep.subr.mxu1 %v993_v38  ;;  %v2256_v51 = vpop.eup %1707  ;;  %v989_v52 = vmul.f32 %v2253_v48, %v578_v47 }
 0x4d0   : > { %1576 = vmatpush3.msra.mxu1 %v993_v38  ;;  %v988_v53 = vmul.f32 %v2256_v51, %v577_v50 }
 0x4d1   : > { %1577 = vmatprep.subr.mxu1 %v992_v42 }
 0x4d2   : > { %1578 = vmatpush3.msra.mxu1 %v992_v42 }
 0x4d3   : > { %1579 = vmatprep.subr.mxu1 %v991_v46 }
 0x4d4   : > { %1580 = vmatpush3.msra.mxu1 %v991_v46 }
 0x4d5   : > { %1581 = vmatprep.subr.mxu1 %v990_v49 }
 0x4d6   : > { %1582 = vmatpush3.msra.mxu1 %v990_v49 }
 0x4d7   : > { %1583 = vmatprep.subr.mxu1 %v989_v52 }
 0x4d8   : > { %1584 = vmatpush3.msra.mxu1 %v989_v52 }
 0x4d9   : > { %1585 = vmatprep.subr.mxu1 %v988_v53 }
 0x4da   : > { %1586 = vmatpush3.msra.mxu1 %v988_v53 }
 0x4db   : > { %1588 = vmatmul.mubr.msk.f32.vlgmr.msra.gmra.mxu1 %vm458_vm0, %v997_v54 }
 0x4dc   : > { %1590 = vmatprep.mubr.msk.f32.mxu1 %vm458_vm0, %v998_v55 }
 0x4df   : > { %1591 = vmatmul.mubr.msk.f32.gmra.mxu1 %vm458_vm0, %v999_v56 }
 0x59b   : > { %v1589_v57 = vpop.f32.mrf.mxu1 }
 0x59c   : > { %v1088_v2 = vadd.f32 %v1589_v57, %v1001_v59 }
 0x59d   : > { %v1082_v60 = vpop.f32.mrf.mxu1 }
 0x59e   : > { %v1083_v62 = vadd.f32 %v1082_v60, %v1000_v58  ;;  %v1103_v24 = vsel %vm1101_vm3, %v1088_v2, -inf }
 0x59f   : > { %v1592_v63 = vpop.f32.mrf.mxu1 }
 0x5a0   : > { %v1098_v11 = vadd.f32 %v1592_v63, %v1003_v61  ;;  %v1102_v21 = vsel %vm1101_vm3, %v1083_v62, -inf }
 0x5a1   : > { %v1092_v20 = vpop.f32.mrf.mxu1  ;;  %v1106_v27 = vmax.f32 %v1102_v21, %v1103_v24  ;;  %v1186_v24 = vld [vmem:[%s2419_s8] sm:$0xff] }
 0x5a2   : > { %v1093_v22 = vadd.f32 %v1092_v20, %v1002_v0  ;;  %v1105_v25 = vsel %vm1101_vm3, %v1098_v11, -inf }
 0x5a4   : > { %v1104_v26 = vsel %vm1101_vm3, %v1093_v22, -inf }
 0x5a5   : > { %v1107_v28 = vmax.f32 %v1104_v26, %v1105_v25  ;;  %v1188_v25 = vld [vmem:[%s2419_s8 + $0x10] sm:$0xff] }
 0x5a7   : > { %v1108_v29 = vmax.f32 %v1106_v27, %v1107_v28 }
 0x5a9   : > { %v1109_v31 = vrot.slane %v1108_v29, 4 }
 0x5ab   : > { %v1110_v32 = vmax.f32 %v1108_v29, %v1109_v31  ;;  %v1189_v31 = vld [vmem:[%s2419_s8 + $0x18] sm:$0xff] }
 0x5ad   : > { %v1111_v34 = vrot.slane %v1110_v32, 2 }
 0x5af   : > { %v1112_v35 = vmax.f32 %v1110_v32, %v1111_v34 }
 0x5b1   : > { %v1113_v36 = vrot.slane %v1112_v35, 1 }
 0x5b3   : > { %v1114_v38 = vmax.f32 %v1112_v35, %v1113_v36 }
 0x5b5   : > { %v1115_v39 = vsub.f32 %v1083_v62, %v1114_v38  ;;  %v1116_v41 = vsub.f32 %v1088_v2, %v1114_v38  ;;  %v1117_v42 = vsub.f32 %v1093_v22, %v1114_v38  ;;  %v1118_v43 = vsub.f32 %v1098_v11, %v1114_v38  ;;  %v1187_v22 = vld [vmem:[%s2419_s8 + $0x8] sm:$0xff] }
 0x5b7   : > { %v1119_v45 = vmul.f32 1.442695, %v1115_v39  ;;  %v1123_v46 = vmul.f32 1.442695, %v1117_v42  ;;  %v1121_v47 = vmul.f32 1.442695, %v1116_v41 }
 0x5b8   : > { %v1125_v49 = vmul.f32 1.442695, %v1118_v43 }
 0x5b9   : > { %1709 = vpow2.f32 %v1119_v45 }
 0x5ba   : > { %1711 = vpow2.f32 %v1123_v46 }
 0x5bb   : > { %1713 = vpow2.f32 %v1121_v47 }
 0x5bc   : > { %1715 = vpow2.f32 %v1125_v49 }
 0x5c6   : > { %v1710_v50 = vpop.eup %1709 }
 0x5c7   : > { %v1712_v52 = vpop.eup %1711  ;;  %v1127_v53 = vsel %vm1101_vm3, %v1710_v50, 0.0 }
 0x5c8   : > { %v1714_v54 = vpop.eup %1713  ;;  %v1130_v58 = vsel %vm1101_vm3, %v1712_v52, 0.0 }
 0x5c9   : > { %v1128_v55 = vsel %vm1101_vm3, %v1714_v54, 0.0  ;;  %v1716_v56 = vpop.eup %1715 }
 0x5ca   : > { %v1129_v57 = vadd.f32 %v1128_v55, %v1127_v53  ;;  %v1132_v60 = vsel %vm1101_vm3, %v1716_v56, 0.0 }
 0x5cc   : > { %v1131_v59 = vadd.f32 %v1130_v58, %v1129_v57 }
 0x5ce   : > { %v1133_v61 = vadd.f32 %v1132_v60, %v1131_v59 }
 0x5d0   : > { %v1134_v62 = vrot.slane %v1133_v61, 4 }
 0x5d2   : > { %v1135_v63 = vadd.f32 %v1134_v62, %v1133_v61  ;;  %v1148_v61 = vld [vmem:[#allocation6 + $0x18] sm:$0xff] }
 0x5d4   : > { %v1136_v0 = vrot.slane %v1135_v63, 2 }
 0x5d6   : > { %v1137_v2 = vadd.f32 %v1136_v0, %v1135_v63 }
 0x5d8   : > { %v1138_v11 = vrot.slane %v1137_v2, 1 }
 0x5da   : > { %v1139_v20 = vadd.f32 %v1138_v11, %v1137_v2 }
 0x5dc   : > { %1717 = vrcp.f32 %v1139_v20 }
 0x5e9   : > { %v1718_v21 = vpop.eup %1717 }
 0x5ea   : > { %v1142_v26 = vmul.f32 %v1718_v21, %v1714_v54  ;;  %v1141_v27 = vmul.f32 %v1718_v21, %v1710_v50  ;;  %v1143_v28 = vmul.f32 %v1718_v21, %v1712_v52  ;;  %v1144_v29 = vmul.f32 %v1718_v21, %v1716_v56  ;;  %v1145_v54 = vld [vmem:[#allocation6] sm:$0xff] }
 0x5ec   : > { %1156 = vperm.xlu1 %1670, %v1142_v26   ;;  %v1191_v32 = vmul.f32 %v1187_v22, %v1142_v26  ;;  %1151 = vperm.xlu0 %1669, %v1141_v27   ;;  %v1190_v34 = vmul.f32 %v1186_v24, %v1141_v27  ;;  %v1192_v35 = vmul.f32 %v1188_v25, %v1143_v28 }
 0x5ed   : > { %v1193_v39 = vmul.f32 %v1189_v31, %v1144_v29 }
 0x5ee   : > { %v1195_v36 = vsel %vm1101_vm3, %v1191_v32, 0.0  ;;  %v1194_v38 = vsel %vm1101_vm3, %v1190_v34, 0.0  ;;  %v1197_v42 = vsel %vm1101_vm3, %v1192_v35, 0.0 }
 0x5ef   : > { %v1196_v41 = vadd.f32 %v1195_v36, %v1194_v38  ;;  %v1199_v45 = vsel %vm1101_vm3, %v1193_v39, 0.0 }
 0x5f0   : > { %1161 = vperm.xlu1 %1670, %v1143_v28   ;;  %969 = vperm.xlu0 %1669, %v2236_v1  }
 0x5f1   : > { %v1198_v43 = vadd.f32 %v1197_v42, %v1196_v41 }
 0x5f3   : > { %v1200_v46 = vadd.f32 %v1199_v45, %v1198_v43 }
 0x5f4   : > { %1166 = vperm.xlu1 %1670, %v1144_v29   ;;  %964 = vperm.xlu0 %1669, %v2241_v33   ;;  %v1146_v33 = vld [vmem:[#allocation6 + $0x8] sm:$0xff] }
 0x5f5   : > { %v1201_v47 = vrot.slane %v1200_v46, 4 }
 0x5f7   : > { %v1202_v49 = vadd.f32 %v1201_v47, %v1200_v46 }
 0x5f8   : > { %959 = vperm.xlu1 %1670, %v2238_v30   ;;  %954 = vperm.xlu0 %1669, %v2244_v37   ;;  %v1147_v37 = vld [vmem:[#allocation6 + $0x10] sm:$0xff] }
 0x5f9   : > { %v1203_v50 = vrot.slane %v1202_v49, 2 }
 0x5fb   : > { %v1204_v52 = vadd.f32 %v1203_v50, %v1202_v49 }
 0x5fc   : > { %949 = vperm.xlu1 %1670, %v2247_v40   ;;  %944 = vperm.xlu0 %1669, %v2250_v44  }
 0x5fd   : > { %v1205_v1 = vrot.slane %v1204_v52, 1 }
 0x5ff   : > { %v1206_v53 = vadd.f32 %v1205_v1, %v1204_v52 }
 0x600   : > { %939 = vperm.xlu1 %1670, %v2253_v48   ;;  %934 = vperm.xlu0 %1669, %v2256_v51  }
 0x604   : > { %1209 = vperm.xlu1 %1670, %v1206_v53  }
 0x667   : > { %v1157_v55 = vpop.permute.xlu1 %1156  ;;  %v1152_v56 = vpop.permute.xlu0 %1151 }
 0x668   : > { %v1170_v30 = vmul.f32 %v1157_v55, %v1146_v33  ;;  %v1169_v57 = vmul.f32 %v1152_v56, %v1145_v54 }
 0x66a   : > { %v1174_v58 = vsel %vm458_vm0, %v1170_v30, 0.0  ;;  %v1173_v44 = vsel %vm458_vm0, %v1169_v57, 0.0 }
 0x66b   : > { %v1162_v59 = vpop.permute.xlu1 %1161  ;;  %v970_v40 = vpop.permute.xlu0 %969  ;;  %v1175_v63 = vadd.f32 %v1174_v58, %v1173_v44 }
 0x66c   : > { %v1171_v60 = vmul.f32 %v1162_v59, %v1147_v37  ;;  %v2310_v48 = vmul.f32 %v970_v40, %v2057_v4  ;;  %v2313_v51 = vmul.f32 %v970_v40, %v2054_v3 }
 0x66e   : > { %v1176_v62 = vsel %vm458_vm0, %v1171_v60, 0.0  ;;  %1231 = vmatprep.subr.mxu0 %v2313_v51 }
 0x66f   : > { %v1167_v0 = vpop.permute.xlu1 %1166  ;;  %1232 = vmatpush1.msra.mxu0 %v2310_v48  ;;  %v965_v2 = vpop.permute.xlu0 %964  ;;  %v1177_v21 = vadd.f32 %v1176_v62, %v1175_v63 }
 0x670   : > { %v1172_v11 = vmul.f32 %v1167_v0, %v1148_v61  ;;  %v2319_v20 = vmul.f32 %v965_v2, %v2064_v6  ;;  %v2322_v4 = vmul.f32 %v965_v2, %v2060_v5 }
 0x672   : > { %v1178_v3 = vsel %vm458_vm0, %v1172_v11, 0.0  ;;  %1233 = vmatprep.subr.mxu0 %v2322_v4 }
 0x673   : > { %v1179_v22 = vadd.f32 %v1178_v3, %v1177_v21  ;;  %v960_v24 = vpop.permute.xlu1 %959  ;;  %1234 = vmatpush1.msra.mxu0 %v2319_v20  ;;  %v955_v25 = vpop.permute.xlu0 %954 }
 0x674   : > { %v982_v26 = vmul.f32 %v960_v24, %v2072_v8  ;;  %v2329_v27 = vmul.f32 %v960_v24, %v2068_v7  ;;  %v2332_v28 = vmul.f32 %v955_v25, %v2076_v9  ;;  %v980_v29 = vmul.f32 %v955_v25, %v2080_v10 }
 0x675   : > { %v1180_v6 = vrot.slane %v1179_v22, 4 }
 0x676   : > { %1235 = vmatprep.subr.mxu0 %v2329_v27 }
 0x677   : > { %v1181_v5 = vadd.f32 %v1180_v6, %v1179_v22  ;;  %v950_v31 = vpop.permute.xlu1 %949  ;;  %1236 = vmatpush1.msra.mxu0 %v982_v26  ;;  %v945_v32 = vpop.permute.xlu0 %944 }
 0x678   : > { %v978_v34 = vmul.f32 %v950_v31, %v2088_v13  ;;  %v2338_v35 = vmul.f32 %v950_v31, %v2084_v12  ;;  %1237 = vmatprep.subr.mxu0 %v2332_v28  ;;  %v977_v8 = vmul.f32 %v945_v32, %v2092_v14  ;;  %v976_v36 = vmul.f32 %v945_v32, %v2096_v15 }
 0x679   : > { %v1182_v7 = vrot.slane %v1181_v5, 2  ;;  %1238 = vmatpush1.msra.mxu0 %v980_v29 }
 0x67a   : > { %1239 = vmatprep.subr.mxu0 %v2338_v35 }
 0x67b   : > { %v1183_v9 = vadd.f32 %v1182_v7, %v1181_v5  ;;  %v940_v10 = vpop.permute.xlu1 %939  ;;  %1240 = vmatpush1.msra.mxu0 %v978_v34  ;;  %v935_v38 = vpop.permute.xlu0 %934 }
 0x67c   : > { %v974_v39 = vmul.f32 %v940_v10, %v2104_v17  ;;  %v975_v13 = vmul.f32 %v940_v10, %v2100_v16  ;;  %1241 = vmatprep.subr.mxu0 %v977_v8  ;;  %v973_v41 = vmul.f32 %v935_v38, %v2108_v18  ;;  %v972_v14 = vmul.f32 %v935_v38, %v2112_v19 }
 0x67d   : > { %v1184_v12 = vrot.slane %v1183_v9, 1  ;;  %1242 = vmatpush1.msra.mxu0 %v976_v36 }
 0x67e   : > { %1243 = vmatprep.subr.mxu0 %v975_v13 }
 0x67f   : > { %v1185_v42 = vadd.f32 %v1184_v12, %v1183_v9  ;;  %1244 = vmatpush1.msra.mxu0 %v974_v39  ;;  %v1210_v15 = vpop.permute.xlu1 %1209 }
 0x680   : > { %1245 = vmatprep.subr.mxu0 %v973_v41 }
 0x681   : > { %1246 = vmatpush1.msra.mxu0 %v972_v14 }
 0x682   : > { %1483 = vmatmul.mubr.msk.f32.vlgmr.msra.gmra.mxu0 %vm458_vm0, %v1185_v42 }
 0x742   : > { %v1281_v17 = vpop.f32.mrf.mxu0 }
 0x743   : > { %v1282_v43 = vadd.f32 %v1281_v17, %v1210_v15 }
 0x744   : > { %v1283_v16 = vpop.f32.mrf.mxu0 }
 0x745   : > { %v1484_v45 = vmul.f32 -1.442695, %v1282_v43  ;;  %v1284_v46 = vadd.f32 %v1283_v16, %v1210_v15 }
 0x747   : > { %1719 = vpow2.f32 %v1484_v45  ;;  %v1485_v47 = vmul.f32 -1.442695, %v1284_v46 }
 0x749   : > { %1721 = vpow2.f32 %v1485_v47 }
 0x754   : > { %v1720_v18 = vpop.eup %1719 }
 0x755   : > { %v1292_v49 = vadd.f32 1.0, %v1720_v18 }
 0x756   : > { %v1722_v50 = vpop.eup %1721 }
 0x757   : > { %1723 = vrcp.f32 %v1292_v49  ;;  %v1293_v19 = vadd.f32 1.0, %v1722_v50 }
 0x759   : > { %1725 = vrcp.f32 %v1293_v19 }
 0x764   : > { %v1724_v52 = vpop.eup %1723 }
 0x765   : > { %v1301_v1 = vrot.slane %v1724_v52, %v2121_v23 }
 0x766   : > { %v1726_v53 = vpop.eup %1725 }
 0x767   : > { %v1306_v33 = vmul.f32 %v1301_v1, %v972_v14  ;;  %v1308_v54 = vmul.f32 %v1301_v1, %v974_v39  ;;  %v1310_v55 = vmul.f32 %v1301_v1, %v976_v36  ;;  %v1312_v56 = vmul.f32 %v1301_v1, %v978_v34 }
 0x768   : > { %v1314_v30 = vmul.f32 %v1301_v1, %v980_v29  ;;  %v1316_v57 = vmul.f32 %v1301_v1, %v982_v26  ;;  %v1318_v37 = vmul.f32 %v1301_v1, %v2319_v20  ;;  %v1320_v58 = vmul.f32 %v1301_v1, %v2310_v48 }
 0x769   : > { %1322 = vst [vmem:[%s425_s26] sm:$0xff] %v1306_v33  ;;  %1324 = vst [vmem:[%s425_s26 + $0x10] sm:$0xff] %v1308_v54  ;;  %v1305_v59 = vrot.slane %v1726_v53, %v2121_v23 }
 0x76a   : > { %1326 = vst [vmem:[%s425_s26 + $0x20] sm:$0xff] %v1310_v55  ;;  %1328 = vst [vmem:[%s425_s26 + $0x30] sm:$0xff] %v1312_v56 }
 0x76b   : > { %1330 = vst [vmem:[%s425_s26 + $0x40] sm:$0xff] %v1314_v30  ;;  %1332 = vst [vmem:[%s425_s26 + $0x50] sm:$0xff] %v1316_v57  ;;  %v1307_v40 = vmul.f32 %v1305_v59, %v973_v41  ;;  %v1309_v44 = vmul.f32 %v1305_v59, %v975_v13  ;;  %v1311_v60 = vmul.f32 %v1305_v59, %v977_v8 }
 0x76c   : > { %1334 = vst [vmem:[%s425_s26 + $0x60] sm:$0xff] %v1318_v37  ;;  %1336 = vst [vmem:[%s425_s26 + $0x70] sm:$0xff] %v1320_v58  ;;  %v1313_v61 = vmul.f32 %v1305_v59, %v2338_v35  ;;  %v1315_v23 = vmul.f32 %v1305_v59, %v2332_v28  ;;  %v1317_v48 = vmul.f32 %v1305_v59, %v2329_v27 }
 0x76d   : > { %v1319_v62 = vmul.f32 %v1305_v59, %v2322_v4  ;;  %v1321_v63 = vmul.f32 %v1305_v59, %v2313_v51  ;;  %1323 = vst [vmem:[%s425_s26 + $0x8] sm:$0xff] %v1307_v40  ;;  %1325 = vst [vmem:[%s425_s26 + $0x18] sm:$0xff] %v1309_v44 }
 0x76e   : > { %1327 = vst [vmem:[%s425_s26 + $0x28] sm:$0xff] %v1311_v60  ;;  %1329 = vst [vmem:[%s425_s26 + $0x38] sm:$0xff] %v1313_v61 }
 0x76f   : > { %1331 = vst [vmem:[%s425_s26 + $0x48] sm:$0xff] %v1315_v23  ;;  %1333 = vst [vmem:[%s425_s26 + $0x58] sm:$0xff] %v1317_v48 }
 0x770   : > { %1335 = vst [vmem:[%s425_s26 + $0x68] sm:$0xff] %v1319_v62  ;;  %1337 = vst [vmem:[%s425_s26 + $0x78] sm:$0xff] %v1321_v63 }
 0x771   : > { %1818 = shalt.err (!%p1815_p0)
}
 0x772   : > { %s1819_s16 = scalar_lea.hbm %s2361_s13, 2048  ;;  %s1823_s26 = scalar_lea.hbm %s2422_s11, 4096 }
 0x773   : > { %p1820_p6 = scmp.ne.s32.totalorder %s2361_s13, %s1819_s16  ;;  %p1824_p1 = scmp.lt.s32.totalorder %s2361_s13, %s2422_s11 }
 0x774   : > { %p1825_p5 = scmp.lt.s32.totalorder %s1823_s26, %s1819_s16 }
 0x775   : > { %p1821_p9 = pnand %p1820_p6, %p2434_p12 }
 0x776   : > { %p1826_p3 = por %p1825_p5, %p1824_p1 }
 0x777   : > { %p1822_p13 = pneg %p1821_p9 }
 0x779   : > { %p1827_p10 = pnand %p1826_p3, %p1822_p13 }
 0x77b   : > { %1830 = shalt.err (!%p1827_p10)
}
 0x77c   : > { %s1883_s15 = smov 256   ;;  %s1884_s27 = smov 16  }
 0x77d   : > { %1605 = dma.vmem_to_hbm [thread:$0]  (%p2434_p12), %s2363_s17, 2048, %s2361_s13, %s2371_s12, %s1883_s15, %s1883_s15, %s1884_s27  }
 0x77e PF: > { %p1627_p2 = scmp.ge.s32.totalorder %s1873_s22, 2  ;;  %s1367_s30 = sand.u32 1, %s1861_s19  }
 0x77f   : > { %p2435_p4 = scmp.ne.s32.totalorder %s2427_s29, 0  ;;  %s1368_s14 = scalar_lea.sflag [#allocation5], %s1367_s30 }
 0x781   : > { %p1618_p7 = pnand %p1627_p2, %p2435_p4 }
 0x783   : > { %p1619_p8 = pneg %p1618_p7 }
 0x785   : > { %1856 = dma.done.wait (%p1619_p8), %s1368_s14, 2048  }
 0x786   : > { %1858 = vsyncadd (%p1619_p8), %s1368_s14, 4294965248  ;;  %s2436_s16 = sld [smem:[#allocation13_spill]]  ;;  %p25_p11 = scmp.ge.s32.totalorder %s1973_s24, 4  }
 0x787   : > { %s2437_s19 = smov %s1865_s20  ;;  %s2438_s20 = smov %s1869_s21 }
 0x788   : > { %s2440_s22 = smov %s1973_s24  ;;  %27 = sbr.rel (!%p25_p11) target bundleno = 8 (0x8), region = 112 }
 0x78c   : > { %s2439_s21 = smov %s2436_s16 }
 0x78d   :  { %1373 = vsyncpa [#allocation4], 1 }
 0x78e   :  { %1375 = vsyncpa [#allocation4 + $0x1], 1 }
 0x78f   :  { %1376 = vsyncpa [#allocation7], 1 }
 0x790   :  { %1377 = vsyncpa [#allocation5], 1 }
 0x791   :  { %1379 = vsyncpa [#allocation5 + $0x1], 1 }

</bundles_post_ra>
